<compile_context>
chip_gen: v7x
topology: tpu7x:2x2x1
jax: 0.10.0
libtpu: 0.0.40
codegen_flags: <defaults>
</compile_context>

<pallas_src>
import functools

import jax
import jax.numpy as jnp
from jax.experimental import pallas as pl
from jax.experimental.pallas import tpu as pltpu


# ----------------------------------------------------------------------------
# Fused kernel: conv bank + relu + masked time max-pool + highway + folded head
# ----------------------------------------------------------------------------
def _fused_discriminator_kernel(x_ref, wc_ref, bc_ref, tc_ref,
                                wh_ref, bh_ref, wfo_ref, cfo_ref,
                                o_ref, *, num_taps):
    # x_ref : (B, Lp + num_taps - 1, E) zero-padded embeddings
    # wc_ref: (num_taps*E, F) concatenated, tap-padded conv weights
    # bc_ref: (1, F) concatenated conv biases
    # tc_ref: (1, F) int32 valid conv length per feature column (T_f = L - f + 1)
    # wh_ref: (F, F), bh_ref: (1, F) highway linear
    # wfo_ref: (1, F) folded feature2out@out2logits weight, cfo_ref: (1, 1) folded bias
    # o_ref : (B, 1) logits
    B, Lpad, E = x_ref.shape
    Lp = Lpad - (num_taps - 1)
    F = wc_ref.shape[1]

    x = x_ref[...]                                                    # (B, Lpad, E)

    # im2col windows for the largest filter size: (B, Lp, num_taps*E)
    win = jnp.concatenate([x[:, i:i + Lp, :] for i in range(num_taps)], axis=2)

    # One MXU matmul for all conv branches: M = B*Lp, K = num_taps*E, N = F.
    acc = jnp.dot(win.reshape(B * Lp, num_taps * E), wc_ref[...],
                  preferred_element_type=jnp.float32)                 # (B*Lp, F)
    acc = jnp.maximum(acc + bc_ref[...], 0.0).reshape(B, Lp, F)       # relu(conv + bias)

    # Mask conv positions beyond each branch's valid length, then max-pool over
    # time.  ReLU output is >= 0, so replacing invalid rows with 0 is exact.
    t_idx = jax.lax.broadcasted_iota(jnp.int32, (Lp, F), 0)           # (Lp, F)
    valid = t_idx < tc_ref[...]                                       # (Lp, F) bool
    acc = jnp.where(valid, acc, 0.0)
    p = jnp.max(acc, axis=1)                                          # (B, F) lane-dense slab

    # Highway gate: sigmoid(h) * relu(h) + (1 - sigmoid(h)) * p
    h = jnp.dot(p, wh_ref[...], preferred_element_type=jnp.float32) + bh_ref[...]
    s = jax.nn.sigmoid(h)
    g = s * jnp.maximum(h, 0.0) + (1.0 - s) * p

    # TODO(synk): nn.Dropout(0.5) treated as eval-mode identity (training-mode
    # RNG not reproduced); this also justifies folding feature2out@out2logits.
    # Folded head as VPU multiply + lane reduce (avoids an N=1 MXU matmul).
    o_ref[...] = jnp.sum(g * wfo_ref[...], axis=1, keepdims=True) + cfo_ref[...]


# ----------------------------------------------------------------------------
# Forward wrapper (embedding gather/renorm + weight packing + one pallas_call)
# ----------------------------------------------------------------------------
@functools.partial(jax.jit, static_argnames=("filter_sizes",))
def cnn_discriminator_forward(tokens, params, filter_sizes):
    num_taps = max(filter_sizes)
    B, L = tokens.shape
    E = params["embedding"].shape[1]

    # Embedding lookup; max_norm=5.0 renorm applied only to the gathered rows
    # (padding_idx=0 row is all-zero, so it stays zero).
    rows = jnp.take(params["embedding"], tokens, axis=0).astype(jnp.float32)   # (B, L, E)
    nrm = jnp.sqrt(jnp.sum(rows * rows, axis=-1, keepdims=True))
    x = rows * jnp.minimum(1.0, 5.0 / jnp.maximum(nrm, 1e-7))

    # Evaluate conv at Lp (sublane-aligned) time positions; extra rows are zero
    # padded here and masked in-kernel before the max-pool.
    Lp = ((L + 7) // 8) * 8
    x_pad = jnp.pad(x, ((0, 0), (0, Lp + num_taps - 1 - L), (0, 0)))

    # Pack the conv bank: tap-pad each (f*E, N) weight to (num_taps*E, N) and
    # concatenate along N; same for biases and per-column valid lengths.
    wcols, bcols, tcols = [], [], []
    for fsize, w, b in zip(filter_sizes, params["conv_w"], params["conv_b"]):
        n = w.shape[2]
        wf = jnp.pad(w.reshape(fsize * E, n), ((0, (num_taps - fsize) * E), (0, 0)))
        wcols.append(wf)
        bcols.append(b)
        tcols.append(jnp.full((1, n), L - fsize + 1, jnp.int32))
    wc = jnp.concatenate(wcols, axis=1)            # (num_taps*E, feature_dim)
    bc = jnp.concatenate(bcols, axis=1)            # (1, feature_dim)
    tc = jnp.concatenate(tcols, axis=1)            # (1, feature_dim) int32

    # Fold feature2out @ out2logits (no nonlinearity in between, dropout = id).
    wfo = (params["wf"] @ params["wo"]).reshape(1, -1)       # (1, feature_dim)
    cfo = params["bf"] @ params["wo"] + params["bo"]         # (1, 1)

    vspec = pl.BlockSpec(memory_space=pltpu.MemorySpace.VMEM)
    logits = pl.pallas_call(
        functools.partial(_fused_discriminator_kernel, num_taps=num_taps),
        out_shape=jax.ShapeDtypeStruct((B, 1), jnp.float32),
        in_specs=[vspec] * 8,
        out_specs=vspec,
    )(x_pad, wc, bc, tc, params["wh"], params["bh"], wfo, cfo)
    return jnp.squeeze(logits, axis=1)                        # (B,)


# ----------------------------------------------------------------------------
# Deterministic parameter construction + demo
# ----------------------------------------------------------------------------
def make_params(key, vocab_size, embedding_dim, filter_sizes, num_filters, hidden=100):
    feature_dim = sum(num_filters)
    ks = jax.random.split(key, 2 * len(filter_sizes) + 7)
    ki = iter(ks)

    emb = jax.random.normal(next(ki), (vocab_size, embedding_dim), jnp.float32) * 0.5
    emb = emb.at[0].set(0.0)  # padding_idx=0

    conv_w, conv_b = [], []
    for fsize, nfilt in zip(filter_sizes, num_filters):
        conv_w.append(jax.random.normal(next(ki), (fsize, embedding_dim, nfilt),
                                        jnp.float32) * 0.05)
        conv_b.append(jax.random.normal(next(ki), (1, nfilt), jnp.float32) * 0.05)

    wh = jax.random.normal(next(ki), (feature_dim, feature_dim), jnp.float32) * 0.05
    bh = jax.random.normal(next(ki), (1, feature_dim), jnp.float32) * 0.05
    wf = jax.random.normal(next(ki), (feature_dim, hidden), jnp.float32) * 0.05
    bf = jax.random.normal(next(ki), (1, hidden), jnp.float32) * 0.05
    wo = jax.random.normal(next(ki), (hidden, 1), jnp.float32) * 0.05
    bo = jax.random.normal(next(ki), (1, 1), jnp.float32) * 0.05

    return {"embedding": emb, "conv_w": conv_w, "conv_b": conv_b,
            "wh": wh, "bh": bh, "wf": wf, "bf": bf, "wo": wo, "bo": bo}


if __name__ == "__main__":
    key = jax.random.PRNGKey(0)
    B, L = 2, 8                     # batch, sequence length
    vocab_size = 50
    embedding_dim = 32              # config.discriminator_embedding_dim
    filter_sizes = (2, 3, 4, 5)
    num_filters = (32, 32, 32, 32)  # scaled-down from [300]*4; feature_dim = 128

    k_tok, k_par = jax.random.split(key)
    tokens = jax.random.randint(k_tok, (B, L), 0, vocab_size)
    params = make_params(k_par, vocab_size, embedding_dim, filter_sizes, num_filters)

    logits = cnn_discriminator_forward(tokens, params, filter_sizes)
    jax.block_until_ready(logits)
    assert logits.shape == (B,) and logits.dtype == jnp.float32
    assert bool(jnp.all(jnp.isfinite(logits)))
    print("KERNEL_OK")
</pallas_src>

<mosaic_0001>
module attributes {stable_mosaic.version = 11 : i64} {
  func.func @_fused_discriminator_kernel(%arg0: memref<2x12x32xf32, #tpu.memory_space<vmem>>, %arg1: memref<160x128xf32, #tpu.memory_space<vmem>>, %arg2: memref<1x128xf32, #tpu.memory_space<vmem>>, %arg3: memref<1x128xi32, #tpu.memory_space<vmem>>, %arg4: memref<128x128xf32, #tpu.memory_space<vmem>>, %arg5: memref<1x128xf32, #tpu.memory_space<vmem>>, %arg6: memref<1x128xf32, #tpu.memory_space<vmem>>, %arg7: memref<1x1xf32, #tpu.memory_space<vmem>>, %arg8: memref<2x1xf32, #tpu.memory_space<vmem>>) attributes {dimension_semantics = [], scalar_prefetch = 0 : i64, scratch_operands = 0 : i64, tpu.core_type = #tpu.core_type<tc>} {
    %c0 = arith.constant 0 : index
    %c0_0 = arith.constant 0 : index
    %c0_1 = arith.constant 0 : index
    %0 = vector.load %arg0[%c0, %c0_0, %c0_1] : memref<2x12x32xf32, #tpu.memory_space<vmem>>, vector<2x12x32xf32>
    %1 = vector.extract_strided_slice %0 {offsets = [0, 0, 0], sizes = [2, 8, 32], strides = [1, 1, 1]} : vector<2x12x32xf32> to vector<2x8x32xf32>
    %2 = vector.extract_strided_slice %0 {offsets = [0, 1, 0], sizes = [2, 8, 32], strides = [1, 1, 1]} : vector<2x12x32xf32> to vector<2x8x32xf32>
    %3 = vector.extract_strided_slice %0 {offsets = [0, 2, 0], sizes = [2, 8, 32], strides = [1, 1, 1]} : vector<2x12x32xf32> to vector<2x8x32xf32>
    %4 = vector.extract_strided_slice %0 {offsets = [0, 3, 0], sizes = [2, 8, 32], strides = [1, 1, 1]} : vector<2x12x32xf32> to vector<2x8x32xf32>
    %5 = vector.extract_strided_slice %0 {offsets = [0, 4, 0], sizes = [2, 8, 32], strides = [1, 1, 1]} : vector<2x12x32xf32> to vector<2x8x32xf32>
    %6 = tpu.concatenate %1, %2, %3, %4, %5 in 2 : vector<2x8x32xf32>, vector<2x8x32xf32>, vector<2x8x32xf32>, vector<2x8x32xf32>, vector<2x8x32xf32> -> vector<2x8x160xf32>
    %7 = vector.shape_cast %6 : vector<2x8x160xf32> to vector<16x160xf32>
    %c0_2 = arith.constant 0 : index
    %c0_3 = arith.constant 0 : index
    %8 = vector.load %arg1[%c0_2, %c0_3] : memref<160x128xf32, #tpu.memory_space<vmem>>, vector<160x128xf32>
    %cst = arith.constant dense<0.000000e+00> : vector<16x128xf32>
    %9 = tpu.matmul %7, %8, %cst {dimension_numbers = #tpu.dot_dimension_numbers<[1], [0], [0], [1], [0, 0, 1, 1], [], []>} : vector<16x160xf32>, vector<160x128xf32>, vector<16x128xf32> -> vector<16x128xf32>
    %c0_4 = arith.constant 0 : index
    %c0_5 = arith.constant 0 : index
    %10 = vector.load %arg2[%c0_4, %c0_5] : memref<1x128xf32, #tpu.memory_space<vmem>>, vector<1x128xf32>
    %11 = vector.broadcast %10 : vector<1x128xf32> to vector<16x128xf32>
    %12 = arith.addf %9, %11 : vector<16x128xf32>
    %cst_6 = arith.constant 0.000000e+00 : f32
    %13 = vector.broadcast %cst_6 : f32 to vector<16x128xf32>
    %14 = arith.maximumf %12, %13 : vector<16x128xf32>
    %15 = vector.shape_cast %14 : vector<16x128xf32> to vector<2x8x128xf32>
    %16 = tpu.iota {dimensions = array<i32: 0>} : vector<8x128xi32>
    %c0_7 = arith.constant 0 : index
    %c0_8 = arith.constant 0 : index
    %17 = vector.load %arg3[%c0_7, %c0_8] : memref<1x128xi32, #tpu.memory_space<vmem>>, vector<1x128xi32>
    %18 = vector.broadcast %17 : vector<1x128xi32> to vector<8x128xi32>
    %19 = arith.cmpi slt, %16, %18 : vector<8x128xi32>
    %cst_9 = arith.constant 0.000000e+00 : f32
    %20 = vector.shape_cast %19 : vector<8x128xi1> to vector<1x8x128xi1>
    %21 = vector.broadcast %20 : vector<1x8x128xi1> to vector<2x8x128xi1>
    %22 = vector.broadcast %cst_9 : f32 to vector<2x8x128xf32>
    %23 = arith.select %21, %15, %22 : vector<2x8x128xi1>, vector<2x8x128xf32>
    %cst_10 = arith.constant dense<0xFF800000> : vector<2x128xf32>
    %24 = vector.multi_reduction <maximumf>, %23, %cst_10 [1] : vector<2x8x128xf32> to vector<2x128xf32>
    %c0_11 = arith.constant 0 : index
    %c0_12 = arith.constant 0 : index
    %25 = vector.load %arg4[%c0_11, %c0_12] : memref<128x128xf32, #tpu.memory_space<vmem>>, vector<128x128xf32>
    %cst_13 = arith.constant dense<0.000000e+00> : vector<2x128xf32>
    %26 = tpu.matmul %24, %25, %cst_13 {dimension_numbers = #tpu.dot_dimension_numbers<[1], [0], [0], [1], [0, 0, 1, 1], [], []>} : vector<2x128xf32>, vector<128x128xf32>, vector<2x128xf32> -> vector<2x128xf32>
    %c0_14 = arith.constant 0 : index
    %c0_15 = arith.constant 0 : index
    %27 = vector.load %arg5[%c0_14, %c0_15] : memref<1x128xf32, #tpu.memory_space<vmem>>, vector<1x128xf32>
    %28 = vector.broadcast %27 : vector<1x128xf32> to vector<2x128xf32>
    %29 = arith.addf %26, %28 : vector<2x128xf32>
    %30 = arith.negf %29 : vector<2x128xf32>
    %31 = math.exp %30 : vector<2x128xf32>
    %cst_16 = arith.constant 1.000000e+00 : f32
    %32 = vector.broadcast %cst_16 : f32 to vector<2x128xf32>
    %33 = arith.addf %32, %31 : vector<2x128xf32>
    %34 = arith.divf %32, %33 : vector<2x128xf32>
    %cst_17 = arith.constant 0.000000e+00 : f32
    %35 = vector.broadcast %cst_17 : f32 to vector<2x128xf32>
    %36 = arith.maximumf %29, %35 : vector<2x128xf32>
    %37 = arith.mulf %34, %36 : vector<2x128xf32>
    %cst_18 = arith.constant 1.000000e+00 : f32
    %38 = vector.broadcast %cst_18 : f32 to vector<2x128xf32>
    %39 = arith.subf %38, %34 : vector<2x128xf32>
    %40 = arith.mulf %39, %24 : vector<2x128xf32>
    %41 = arith.addf %37, %40 : vector<2x128xf32>
    %c0_19 = arith.constant 0 : index
    %c0_20 = arith.constant 0 : index
    %42 = vector.load %arg6[%c0_19, %c0_20] : memref<1x128xf32, #tpu.memory_space<vmem>>, vector<1x128xf32>
    %43 = vector.broadcast %42 : vector<1x128xf32> to vector<2x128xf32>
    %44 = arith.mulf %41, %43 : vector<2x128xf32>
    %cst_21 = arith.constant dense<0.000000e+00> : vector<2xf32>
    %45 = vector.multi_reduction <add>, %44, %cst_21 [1] : vector<2x128xf32> to vector<2xf32>
    %46 = vector.shape_cast %45 : vector<2xf32> to vector<2x1xf32>
    %c0_22 = arith.constant 0 : index
    %c0_23 = arith.constant 0 : index
    %47 = vector.load %arg7[%c0_22, %c0_23] : memref<1x1xf32, #tpu.memory_space<vmem>>, vector<1x1xf32>
    %48 = vector.broadcast %47 : vector<1x1xf32> to vector<2x1xf32>
    %49 = arith.addf %46, %48 : vector<2x1xf32>
    %c0_24 = arith.constant 0 : index
    %c0_25 = arith.constant 0 : index
    %50 = vector.load %arg8[%c0_24, %c0_25] : memref<2x1xf32, #tpu.memory_space<vmem>>, vector<2x1xf32>
    tpu.vector_store %arg8[%c0_24, %c0_25], %49 {strides = array<i32>} : memref<2x1xf32, #tpu.memory_space<vmem>>, vector<2x1xf32>,
    return
  }
}

</mosaic_0001>

<bundles_post_ra>
// kernel: cnn_discriminator_forward.1
= control target key start
LH: loop header
LB: loop body
LE: loop exit
PB: predicated region body
PF: predicated region fallthrough
CT: control target
= control target key end

     0   :  { %vm39_vm0 = vcmask 1046528   ;;  %vm65_vm1 = vcmask 1044480   ;;  %vm52_vm2 = vcmask 1045504   ;;  %v485_v3 = vmov 0.0|0.0   ;;  %s486_s17 = smov 32   ;;  %s488_s22 = smov 64   ;;  %s720_s0 = inlined_call_operand.vmem [shape: f32[2,12,32], index: 0, kind: input, shape index: {}]   ;;  %s721_s1 = inlined_call_operand.vmem [shape: f32[160,128], index: 1, kind: input, shape index: {}]   ;;  %s722_s4 = inlined_call_operand.vmem [shape: f32[128,128], index: 4, kind: input, shape index: {}]   ;;  %s723_s2 = inlined_call_operand.vmem [shape: f32[1,128], index: 2, kind: input, shape index: {}]   ;;  %s724_s3 = inlined_call_operand.vmem [shape: s32[1,128], index: 3, kind: input, shape index: {}]   ;;  %s725_s7 = inlined_call_operand.<no memory space> [shape: f32[1,1], index: 7, kind: input, shape index: {}]   ;;  %s726_s5 = inlined_call_operand.vmem [shape: f32[1,128], index: 5, kind: input, shape index: {}]   ;;  %s727_s6 = inlined_call_operand.vmem [shape: f32[1,128], index: 6, kind: input, shape index: {}]   ;;  %s728_s8 = inlined_call_operand.vmem [shape: f32[2,1], index: 8, kind: output, shape index: {}]  }
   0x1   :  { %v539_v0 = vld [vmem:[%s720_s0] sm:$0xff]  ;;  %v32_v1 = vld [vmem:[%s720_s0 + $0x8] sm:$0xf]  ;;  %v547_v2 = vld [vmem:[%s720_s0 + $0x10] sm:$0xff]  ;;  %421 = vmatprep.subr.bf16.mxu0 %v485_v3  ;;  %451 = vmatprep.subr.bf16.mxu1 %v485_v3  ;;  %vm78_vm3 = vcmask 1043456   ;;  %vm85_vm4 = vcmask 261120  }
   0x2   :  { %v40_v4 = vrot.slane %v539_v0, 1  ;;  %v41_v5 = vrot.slane %v32_v1, 1  ;;  %v66_v6 = vrot.slane %v539_v0, 3  ;;  %v67_v7 = vrot.slane %v32_v1, 3  ;;  %v34_v8 = vld [vmem:[%s720_s0 + $0x18] sm:$0xf] }
   0x3   :  { %v53_v9 = vrot.slane %v539_v0, 2  ;;  %v54_v10 = vrot.slane %v32_v1, 2  ;;  %v43_v11 = vrot.slane %v547_v2, 1  ;;  %v44_v12 = vrot.slane %v34_v8, 1  ;;  %v94_v13 = vld [vmem:[%s721_s1] sm:$0xff]  ;;  %v95_v14 = vld [vmem:[%s721_s1 + $0x8] sm:$0xff] }
   0x4   :  { %v42_v15 = vsel %vm39_vm0, %v40_v4, %v41_v5  ;;  %v68_v16 = vsel %vm65_vm1, %v66_v6, %v67_v7  ;;  %s487_s0 = smov 96   ;;  %v56_v18 = vrot.slane %v547_v2, 2  ;;  %v57_v19 = vrot.slane %v34_v8, 2  ;;  %v96_v20 = vld [vmem:[%s721_s1 + $0x10] sm:$0xff]  ;;  %v97_v21 = vld [vmem:[%s721_s1 + $0x18] sm:$0xff]  ;;  %v98_v29 = vld [vmem:[%s721_s1 + $0x20] sm:$0xff] }
   0x5   :  { %46 = vrot.lane.b32.xlu0 %v42_v15, %s486_s17  ;;  %72 = vrot.lane.b32.xlu1 %v68_v16, %s487_s0  ;;  %v55_v17 = vsel %vm52_vm2, %v53_v9, %v54_v10  ;;  %v45_v22 = vsel %vm39_vm0, %v43_v11, %v44_v12  ;;  %v69_v23 = vrot.slane %v547_v2, 3  ;;  %v70_v24 = vrot.slane %v34_v8, 3  ;;  %v99_v30 = vld [vmem:[%s721_s1 + $0x28] sm:$0xff]  ;;  %v226_v36 = vld [vmem:[%s722_s4] sm:$0xff] }
   0x6   :  { %v422_v25 = vpack.c.bf16 %v95_v14, %v94_v13  ;;  %v425_v26 = vpack.c.bf16 %v97_v21, %v96_v20  ;;  %v79_v27 = vrot.slane %v539_v0, 4  ;;  %v80_v28 = vrot.slane %v32_v1, 4  ;;  %v227_v37 = vld [vmem:[%s722_s4 + $0x8] sm:$0xff]  ;;  %v228_v38 = vld [vmem:[%s722_s4 + $0x10] sm:$0xff]  ;;  %v229_v39 = vld [vmem:[%s722_s4 + $0x18] sm:$0xff] }
   0x7   :  { %v82_v31 = vrot.slane %v547_v2, 4  ;;  %v58_v32 = vsel %vm52_vm2, %v56_v18, %v57_v19  ;;  %v71_v33 = vsel %vm65_vm1, %v69_v23, %v70_v24  ;;  %v83_v35 = vrot.slane %v34_v8, 4  ;;  %v100_v43 = vld [vmem:[%s721_s1 + $0x30] sm:$0xff]  ;;  %v101_v44 = vld [vmem:[%s721_s1 + $0x38] sm:$0xff]  ;;  %v102_v47 = vld [vmem:[%s721_s1 + $0x40] sm:$0xff] }
   0x8   :  { %423 = vmatpush1.bf16.msra.mxu0 %v422_v25  ;;  %v81_v34 = vsel %vm78_vm3, %v79_v27, %v80_v28  ;;  %v428_v40 = vpack.c.bf16 %v99_v30, %v98_v29  ;;  %v452_v42 = vpack.c.bf16 %v227_v37, %v226_v36  ;;  %v455_v45 = vpack.c.bf16 %v229_v39, %v228_v38  ;;  %v103_v48 = vld [vmem:[%s721_s1 + $0x48] sm:$0xff]  ;;  %v104_v50 = vld [vmem:[%s721_s1 + $0x50] sm:$0xff]  ;;  %v105_v51 = vld [vmem:[%s721_s1 + $0x58] sm:$0xff] }
   0x9   :  { %59 = vrot.lane.b32.xlu0 %v55_v17, %s488_s22  ;;  %48 = vrot.lane.b32.xlu1 %v45_v22, %s486_s17  ;;  %v84_v41 = vsel %vm78_vm3, %v82_v31, %v83_v35  ;;  %v431_v46 = vpack.c.bf16 %v101_v44, %v100_v43  ;;  %v434_v49 = vpack.c.bf16 %v103_v48, %v102_v47  ;;  %v106_v53 = vld [vmem:[%s721_s1 + $0x60] sm:$0xff]  ;;  %v107_v54 = vld [vmem:[%s721_s1 + $0x68] sm:$0xff]  ;;  %vm88_vm5 = vcmask 523264  }
   0xa   :  { %424 = vmatprep.subr.bf16.mxu0 %v485_v3  ;;  %362 = vmatprep.mubr.msk.f32.mxu0 %vm85_vm4, %v81_v34  ;;  %v437_v52 = vpack.c.bf16 %v105_v51, %v104_v50  ;;  %v440_v55 = vpack.c.bf16 %v107_v54, %v106_v53  ;;  %v108_v56 = vld [vmem:[%s721_s1 + $0x70] sm:$0xff]  ;;  %v109_v57 = vld [vmem:[%s721_s1 + $0x78] sm:$0xff]  ;;  %v110_v59 = vld [vmem:[%s721_s1 + $0x80] sm:$0xff]  ;;  %vm91_vm6 = vcmask 785408   ;;  %vm489_vm7 = vmmov 0  }
   0xb   :  { %453 = vmatpush3.bf16.msra.mxu1 %v452_v42  ;;  %v443_v58 = vpack.c.bf16 %v109_v57, %v108_v56  ;;  %v111_v60 = vld [vmem:[%s721_s1 + $0x88] sm:$0xff]  ;;  %v112_v62 = vld [vmem:[%s721_s1 + $0x90] sm:$0xff]  ;;  %v113_v63 = vld [vmem:[%s721_s1 + $0x98] sm:$0xff]  ;;  %vm251_vm9 = vcmask 1041409   ;;  %vm343_vm10 = vcmask 1041408   ;;  %vm355_vm11 = vcmask 1024  }
   0xc   :  { %426 = vmatpush1.bf16.msra.mxu0 %v425_v26  ;;  %454 = vmatprep.subr.bf16.mxu1 %v485_v3  ;;  %v446_v61 = vpack.c.bf16 %v111_v60, %v110_v59  ;;  %v449_v1 = vpack.c.bf16 %v113_v63, %v112_v62  ;;  %v230_v16 = vld [vmem:[%s722_s4 + $0x20] sm:$0xff]  ;;  %v233_v18 = vld [vmem:[%s722_s4 + $0x38] sm:$0xff]  ;;  %v235_v21 = vld [vmem:[%s722_s4 + $0x48] sm:$0xff]  ;;  %v13_v59 = vstv %s725_s7 }
   0xd   :  { %61 = vrot.lane.b32.xlu0 %v58_v32, %s488_s22  ;;  %74 = vrot.lane.b32.xlu1 %v71_v33, %s487_s0  ;;  %v234_v20 = vld [vmem:[%s722_s4 + $0x40] sm:$0xff]  ;;  %v236_v23 = vld [vmem:[%s722_s4 + $0x50] sm:$0xff]  ;;  %v490_v32 = vmov 0.0   ;;  %v202_v33 = vlaneseq  ;;  %14 = vst [vmem:[#allocation2] sm:$0x1] %v13_v59 }
   0xe   :  { %427 = vmatprep.subr.bf16.mxu0 %v485_v3  ;;  %v464_v22 = vpack.c.bf16 %v235_v21, %v234_v20  ;;  %v237_v24 = vld [vmem:[%s722_s4 + $0x58] sm:$0xff]  ;;  %v238_v26 = vld [vmem:[%s722_s4 + $0x60] sm:$0xff]  ;;  %v239_v27 = vld [vmem:[%s722_s4 + $0x68] sm:$0xff]  ;;  %418 = vmatprep.mubr.msk.f32.mxu1 %vm489_vm7, %v490_v32 }
   0xf   :  { %456 = vmatpush3.bf16.msra.mxu1 %v455_v45  ;;  %v467_v25 = vpack.c.bf16 %v237_v24, %v236_v23  ;;  %v470_v28 = vpack.c.bf16 %v239_v27, %v238_v26  ;;  %v240_v29 = vld [vmem:[%s722_s4 + $0x70] sm:$0xff]  ;;  %v241_v30 = vld [vmem:[%s722_s4 + $0x78] sm:$0xff]  ;;  %v361_v34 = vld [vmem:[%s723_s2] ss:$0 sm:$0xff]  ;;  %v203_v35 = vshrl.u32 %v202_v33, 7 }
  0x10   :  { %429 = vmatpush1.bf16.msra.mxu0 %v428_v40  ;;  %457 = vmatprep.subr.bf16.mxu1 %v485_v3  ;;  %v473_v31 = vpack.c.bf16 %v241_v30, %v240_v29  ;;  %v365_v60 = vld [vmem:[%s726_s5] ss:$0 sm:$0xff] }
  0x11   :  { %430 = vmatprep.subr.bf16.mxu0 %v485_v3 }
  0x14   :  { %432 = vmatpush1.bf16.msra.mxu0 %v431_v46 }
  0x15   :  { %433 = vmatprep.subr.bf16.mxu0 %v485_v3 }
  0x18   :  { %435 = vmatpush1.bf16.msra.mxu0 %v434_v49 }
  0x19   :  { %436 = vmatprep.subr.bf16.mxu0 %v485_v3 }
  0x1c   :  { %438 = vmatpush1.bf16.msra.mxu0 %v437_v52 }
  0x1d   :  { %439 = vmatprep.subr.bf16.mxu0 %v485_v3 }
  0x20   :  { %441 = vmatpush1.bf16.msra.mxu0 %v440_v55 }
  0x21   :  { %442 = vmatprep.subr.bf16.mxu0 %v485_v3 }
  0x24   :  { %444 = vmatpush1.bf16.msra.mxu0 %v443_v58 }
  0x25   :  { %445 = vmatprep.subr.bf16.mxu0 %v485_v3 }
  0x28   :  { %447 = vmatpush1.bf16.msra.mxu0 %v446_v61 }
  0x29   :  { %448 = vmatprep.subr.bf16.mxu0 %v485_v3 }
  0x2c   :  { %450 = vmatpush1.bf16.msra.mxu0 %v449_v1 }
  0x77   :  { %v47_v4 = vpop.permute.xlu0 %46  ;;  %v73_v5 = vpop.permute.xlu1 %72 }
  0x78   :  { %v86_v6 = vsel %vm85_vm4, %v539_v0, %v47_v4  ;;  %v231_v0 = vld [vmem:[%s722_s4 + $0x28] sm:$0xff] }
  0x79   :  { %v458_v17 = vpack.c.bf16 %v231_v0, %v230_v16 }
  0x7b   :  { %v60_v7 = vpop.permute.xlu0 %59  ;;  %v49_v8 = vpop.permute.xlu1 %48  ;;  %459 = vmatpush3.bf16.msra.mxu1 %v458_v17 }
  0x7c   :  { %v89_v9 = vsel %vm88_vm5, %v86_v6, %v60_v7  ;;  %v87_v11 = vsel %vm85_vm4, %v547_v2, %v49_v8  ;;  %460 = vmatprep.subr.bf16.mxu1 %v485_v3  ;;  %v232_v2 = vld [vmem:[%s722_s4 + $0x30] sm:$0xff] }
  0x7d   :  { %v92_v10 = vsel %vm91_vm6, %v89_v9, %v73_v5  ;;  %v461_v19 = vpack.c.bf16 %v233_v18, %v232_v2 }
  0x7e   :  { %190 = vmatmul.mubr.f32.vlgmr.msra.gmra.mrb[0].mxu0 %v92_v10 }
  0x7f   :  { %v62_v12 = vpop.permute.xlu0 %61  ;;  %v75_v13 = vpop.permute.xlu1 %74  ;;  %363 = vmatprep.mubr.msk.f32.mxu0 %vm85_vm4, %v84_v41  ;;  %462 = vmatpush3.bf16.msra.mxu1 %v461_v19 }
  0x80   :  { %v90_v14 = vsel %vm88_vm5, %v87_v11, %v62_v12  ;;  %463 = vmatprep.subr.bf16.mxu1 %v485_v3  ;;  %v367_v11 = vld [vmem:[%s727_s6] ss:$0 sm:$0xff] }
  0x81   :  { %v93_v15 = vsel %vm91_vm6, %v90_v14, %v75_v13 }
  0x82   :  { %195 = vmatmul.mubr.f32.gmra.mrb[2].mxu0 %v93_v15  ;;  %v368_v15 = vld [vmem:[#allocation2] ss:$0 sm:$0xff] }
  0x83   :  { %465 = vmatpush3.bf16.msra.mxu1 %v464_v22 }
  0x84   :  { %466 = vmatprep.subr.bf16.mxu1 %v485_v3 }
  0x87   :  { %468 = vmatpush3.bf16.msra.mxu1 %v467_v25 }
  0x88   :  { %469 = vmatprep.subr.bf16.mxu1 %v485_v3 }
  0x8b   :  { %471 = vmatpush3.bf16.msra.mxu1 %v470_v28 }
  0x8c   :  { %472 = vmatprep.subr.bf16.mxu1 %v485_v3  ;;  %v364_v3 = vld [vmem:[%s724_s3] ss:$0 sm:$0xff] }
  0x8d   :  { %vm209_vm8 = vcmp.lt.s32.totalorder %v203_v35, %v364_v3 }
  0x8f   :  { %474 = vmatpush3.bf16.msra.mxu1 %v473_v31 }
 0x151   :  { %v191_v36 = vpop.f32.mrb[0].mxu0 }
 0x152   :  { %v192_v37 = vadd.f32 %v361_v34, %v191_v36  ;;  %v193_v38 = vpop.f32.mrb[1].mxu0 }
 0x154   :  { %v200_v39 = vmax.f32 %v192_v37, 0.0 }
 0x155   :  { %v196_v40 = vpop.f32.mrb[2].mxu0 }
 0x156   :  { %v212_v41 = vsel %vm209_vm8, %v200_v39, 0.0  ;;  %v197_v42 = vadd.f32 %v361_v34, %v196_v40  ;;  %v198_v43 = vpop.f32.mrb[3].mxu0 }
 0x157   :  { %v214_v44 = vrot.slane %v212_v41, 4 }
 0x158   :  { %v201_v45 = vmax.f32 %v197_v42, 0.0 }
 0x159   :  { %v215_v46 = vmax.f32 %v212_v41, %v214_v44 }
 0x15a   :  { %v213_v47 = vsel %vm209_vm8, %v201_v45, 0.0 }
 0x15b   :  { %v216_v48 = vrot.slane %v215_v46, 2  ;;  %v220_v49 = vrot.slane %v213_v47, 4 }
 0x15d   :  { %v217_v50 = vmax.f32 %v215_v46, %v216_v48  ;;  %v221_v51 = vmax.f32 %v213_v47, %v220_v49 }
 0x15f   :  { %v222_v52 = vrot.slane %v221_v51, 2  ;;  %v218_v53 = vrot.slane %v217_v50, 1 }
 0x161   :  { %v223_v54 = vmax.f32 %v221_v51, %v222_v52  ;;  %v219_v56 = vmax.f32 %v217_v50, %v218_v53 }
 0x163   :  { %v224_v55 = vrot.slane %v223_v54, 1 }
 0x165   :  { %v225_v57 = vmax.f32 %v223_v54, %v224_v55 }
 0x167   :  { %v252_v58 = vsel %vm251_vm9, %v225_v57, %v219_v56 }
 0x168   :  { %419 = vmatmul.mubr.f32.vlgmr.msra.gmra.mrb[0].mxu1 %v252_v58 }
 0x23b   :  { %v320_v61 = vpop.f32.mrb[0].mxu1 }
 0x23c   :  { %v321_v62 = vadd.f32 %v365_v60, %v320_v61  ;;  %v420_v63 = vpop.f32.mrb[1].mxu1 }
 0x23e   :  { %v366_v1 = vmul.f32 -1.442695, %v321_v62  ;;  %v330_v7 = vmax.f32 %v321_v62, 0.0 }
 0x240   :  { %481 = vpow2.f32 %v366_v1 }
 0x24a   :  { %v482_v4 = vpop.eup %481 }
 0x24b   :  { %v327_v5 = vadd.f32 1.0, %v482_v4 }
 0x24d   :  { %483 = vrcp.f32 %v327_v5 }
 0x257   :  { %v484_v6 = vpop.eup %483 }
 0x258   :  { %v332_v8 = vsub.f32 1.0, %v484_v6  ;;  %v331_v9 = vmul.f32 %v484_v6, %v330_v7 }
 0x25a   :  { %v333_v10 = vmul.f32 %v332_v8, %v252_v58 }
 0x25c   :  { %v334_v12 = vadd.f32 %v333_v10, %v331_v9 }
 0x25e   :  { %v342_v13 = vmul.f32 %v367_v11, %v334_v12 }
 0x260   :  { %v344_v14 = vsel %vm343_vm10, %v342_v13, 0.0 }
 0x261   :  { %345 = vadd.xlane.f32.xlu0 %v344_v14 }
 0x2ee   :  { %v346_v16 = vpop.xlane.xlu0 %345 }
 0x2ef   :  { %v354_v0 = vadd.f32 %v368_v15, %v346_v16 }
 0x2f1   :  { %356 = vst.msk [vmem:[%s728_s8] sm:$0x3] %vm355_vm11, %v354_v0 }

</bundles_post_ra>
